<compile_context>
chip_gen: v7x
topology: tpu7x:2x2x1
jax: 0.10.0
libtpu: 0.0.40
codegen_flags: <defaults>
</compile_context>

<pallas_src>
import jax
import jax.numpy as jnp
from jax.experimental import pallas as pl
from jax.experimental.pallas import tpu as pltpu

EPS = 1e-5  # nn.LayerNorm default


def _round_up(x, m):
    return (x + m - 1) // m * m


def _vmem_budget_bytes():
    # Query physical VMEM when possible; fall back to the v7x per-TC 64 MiB
    # (most conservative).  Leave headroom and never ask for more than 100 MiB.
    cap = 64 * 1024 * 1024
    try:
        info = pltpu.get_tpu_info()
        cap = int(getattr(info, "vmem_capacity_bytes", cap))
    except Exception:
        pass
    return min(int(cap * 0.85), 100 * 1024 * 1024)


def _select_tiles(rows, d_pad, n_pad, x_itemsize, out_itemsize, budget):
    rows8 = _round_up(rows, 8)
    if n_pad <= 1024:
        # Single column step: the regime is HBM-bound on x/out streaming, so
        # prefer big row tiles (measured ~85% of roofline at 512+).
        tn_cands = (n_pad,)
        tm_cands = (1024, 512, 256, 128, 64, 32, 16, 8)
    else:
        # Large D: cap tn at 512 (multiple of the 256-wide MXU) so
        # double-buffered W tiles stay small on 64 MiB v7x VMEM; keep tm as
        # large as the budget allows to maximize FLOPs per W byte.
        tn_cands = (512, 256)
        tm_cands = (512, 256, 128, 64, 32, 16, 8)

    def footprint(tm, tn):
        return (2 * tm * d_pad * x_itemsize      # double-buffered x tile
                + 2 * d_pad * tn * 2             # double-buffered bf16 W tile
                + 2 * tm * tn * out_itemsize     # double-buffered out tile
                + tm * d_pad * 2                 # resident bf16 y scratch
                + 8 * (d_pad + n_pad) * 4)       # gamma/beta/bias + slack

    for tm in tm_cands:
        tm_eff = min(tm, rows8)
        for tn in tn_cands:
            if footprint(tm_eff, tn) <= budget:
                return tm_eff, tn
    # TODO(synk): for very large D (d_pad >= 16384) add a K grid axis with an
    # f32 accumulator scratch instead of collapsing the tiles further.
    return min(8, rows8), tn_cands[-1]


def _make_kernel(inv_d):
    # inv_d = 1 / true_D so zero-padded lanes do not corrupt the stats
    # (padded x lanes are 0 => sums unchanged; padded gamma/beta are 0 =>
    #  padded y lanes are 0; padded W rows/cols are 0 => no output pollution).
    def kernel(x_ref, g_ref, bln_ref, w_ref, bias_ref, o_ref, y_ref):
        # LayerNorm + affine computed once per row tile (j == 0) and cached in
        # a bf16 VMEM scratch, so the XLU reductions / VPU normalize / cast do
        # not contend with MXU pushes on every column step.
        @pl.when(pl.program_id(1) == 0)
        def _():
            x = x_ref[...].astype(jnp.float32)
            s1 = jnp.sum(x, axis=-1, keepdims=True)
            s2 = jnp.sum(x * x, axis=-1, keepdims=True)
            mean = s1 * inv_d
            var = jnp.maximum(s2 * inv_d - mean * mean, 0.0)
            inv_std = jax.lax.rsqrt(var + EPS)
            y = (x - mean) * inv_std * g_ref[...] + bln_ref[...]
            y_ref[...] = y.astype(y_ref.dtype)

        # fn = Linear(dim, dim): bf16 operands on the MXU, f32 accumulation.
        out = jnp.dot(y_ref[...], w_ref[...],
                      preferred_element_type=jnp.float32)
        out = out + bias_ref[...]
        o_ref[...] = out.astype(o_ref.dtype)

    return kernel


def prenorm(x, gamma, beta, w, b):
    B, S, D = x.shape
    rows = B * S

    # Lane-dense, (8,128)-aligned feature dims.  For large D make the output
    # dim a multiple of 256 so tn tiles run the 2x256x256 MXU at full width.
    d_pad = _round_up(D, 128)
    n_pad = d_pad if d_pad <= 1024 else _round_up(D, 256)

    x_itemsize = jnp.dtype(x.dtype).itemsize
    out_itemsize = x_itemsize
    budget = _vmem_budget_bytes()
    tm, tn = _select_tiles(rows, d_pad, n_pad, x_itemsize, out_itemsize, budget)
    rows_pad = _round_up(rows, tm)

    # Wrapper-side layout: only touch HBM when padding is actually required
    # (the common transformer case D % 128 == 0 skips the x round-trip).
    x2 = x.reshape(rows, D)
    if d_pad != D or rows_pad != rows:
        x2 = jnp.pad(x2, ((0, rows_pad - rows), (0, d_pad - D)))

    # NOTE: in a real model the padded/cast parameters below should be
    # prepared once and cached, not rebuilt per call.
    g2 = gamma.astype(jnp.float32)
    bln2 = beta.astype(jnp.float32)
    b2 = b.astype(jnp.float32)
    w2 = w.astype(jnp.bfloat16)   # half the VMEM footprint, full-rate MXU
    if d_pad != D:
        g2 = jnp.pad(g2, (0, d_pad - D))
        bln2 = jnp.pad(bln2, (0, d_pad - D))
    if n_pad != D:
        b2 = jnp.pad(b2, (0, n_pad - D))
    if d_pad != D or n_pad != D:
        w2 = jnp.pad(w2, ((0, d_pad - D), (0, n_pad - D)))
    g2 = g2.reshape(1, d_pad)
    bln2 = bln2.reshape(1, d_pad)
    b2 = b2.reshape(1, n_pad)

    grid = (rows_pad // tm, n_pad // tn)
    n_row_tiles = grid[0]

    cost = pl.CostEstimate(
        flops=2 * rows_pad * d_pad * n_pad,
        transcendentals=rows_pad,
        bytes_accessed=(rows_pad * d_pad * x_itemsize          # x read once
                        + rows_pad * n_pad * out_itemsize      # out written once
                        + n_row_tiles * d_pad * n_pad * 2      # W re-streamed per row tile
                        + 2 * d_pad * 4 + 2 * n_pad * 4),
    )

    out2 = pl.pallas_call(
        _make_kernel(1.0 / D),
        out_shape=jax.ShapeDtypeStruct((rows_pad, n_pad), x.dtype),
        grid_spec=pltpu.PrefetchScalarGridSpec(
            num_scalar_prefetch=0,
            grid=grid,
            in_specs=[
                pl.BlockSpec((tm, d_pad), lambda i, j: (i, 0)),   # x row tile (full D for LN)
                pl.BlockSpec((1, d_pad), lambda i, j: (0, 0)),    # gamma (resident)
                pl.BlockSpec((1, d_pad), lambda i, j: (0, 0)),    # beta  (resident)
                pl.BlockSpec((d_pad, tn), lambda i, j: (0, j)),   # W column tile
                pl.BlockSpec((1, tn), lambda i, j: (0, j)),       # bias column tile
            ],
            out_specs=pl.BlockSpec((tm, tn), lambda i, j: (i, j)),
            scratch_shapes=[pltpu.VMEM((tm, d_pad), jnp.bfloat16)],  # cached y
        ),
        compiler_params=pltpu.CompilerParams(
            # Row axis sharded across TCs (megacore); column axis carries the
            # y scratch so it must be "arbitrary".
            dimension_semantics=("parallel", "arbitrary"),
            vmem_limit_bytes=budget,
        ),
        cost_estimate=cost,
    )(x2, g2, bln2, w2, b2)

    if rows_pad != rows or n_pad != D:
        out2 = out2[:rows, :D]
    return out2.reshape(B, S, D)


def prenorm_ref(x, gamma, beta, w, b):
    # Reference follows the same precision policy as the kernel:
    # LayerNorm in f32, matmul with bf16 operands and f32 accumulation.
    xf = x.astype(jnp.float32)
    mean = jnp.mean(xf, axis=-1, keepdims=True)
    var = jnp.mean((xf - mean) ** 2, axis=-1, keepdims=True)
    y = (xf - mean) * jax.lax.rsqrt(var + EPS) * gamma + beta
    out = jnp.dot(y.astype(jnp.bfloat16), w.astype(jnp.bfloat16),
                  preferred_element_type=jnp.float32) + b
    return out.astype(x.dtype)


if __name__ == "__main__":
    key = jax.random.PRNGKey(0)
    B, S, D = 2, 8, 32
    k1, k2, k3, k4, k5 = jax.random.split(key, 5)

    x = jax.random.normal(k1, (B, S, D), dtype=jnp.float32)
    # LayerNorm affine params (deterministic, non-trivial)
    gamma = 1.0 + 0.1 * jax.random.normal(k2, (D,), dtype=jnp.float32)
    beta = 0.1 * jax.random.normal(k3, (D,), dtype=jnp.float32)
    # fn = Linear(dim, dim) parameters
    w = jax.random.normal(k4, (D, D), dtype=jnp.float32) / jnp.sqrt(D)
    b = 0.05 * jax.random.normal(k5, (D,), dtype=jnp.float32)

    out = prenorm(x, gamma, beta, w, b)
    jax.block_until_ready(out)

    ref = prenorm_ref(x, gamma, beta, w, b)
    assert out.shape == (B, S, D)
    assert jnp.allclose(out, ref, atol=5e-3, rtol=5e-3), "mismatch vs reference"
    print("KERNEL_OK")
</pallas_src>

<mosaic_0001>
module attributes {stable_mosaic.version = 11 : i64} {
  func.func @kernel(%arg0: i32, %arg1: i32, %arg2: memref<16x128xf32, #tpu.memory_space<vmem>>, %arg3: memref<1x128xf32, #tpu.memory_space<vmem>>, %arg4: memref<1x128xf32, #tpu.memory_space<vmem>>, %arg5: memref<128x128xbf16, #tpu.memory_space<vmem>>, %arg6: memref<1x128xf32, #tpu.memory_space<vmem>>, %arg7: memref<16x128xf32, #tpu.memory_space<vmem>>, %arg8: memref<16x128xbf16, #tpu.memory_space<vmem>>) attributes {dimension_semantics = [#tpu.dimension_semantics<parallel>, #tpu.dimension_semantics<arbitrary>], iteration_bounds = array<i64: 1, 1>, scalar_prefetch = 0 : i64, scratch_operands = 1 : i64, tpu.core_type = #tpu.core_type<tc>, window_params = [{transform_indices = @transform_0, window_bounds = array<i64: 16, 128>}, {pipeline_mode = #tpu.pipeline_mode<synchronous>, transform_indices = @transform_1, window_bounds = array<i64: 1, 128>}, {pipeline_mode = #tpu.pipeline_mode<synchronous>, transform_indices = @transform_2, window_bounds = array<i64: 1, 128>}, {transform_indices = @transform_3, window_bounds = array<i64: 128, 128>}, {transform_indices = @transform_4, window_bounds = array<i64: 1, 128>}, {transform_indices = @transform_5, window_bounds = array<i64: 16, 128>}]} {
    %c0_i32 = arith.constant 0 : i32
    %0 = arith.cmpi eq, %arg1, %c0_i32 : i32
    %1 = arith.extui %0 : i1 to i32
    %c0_i32_0 = arith.constant 0 : i32
    %2 = arith.cmpi ne, %1, %c0_i32_0 : i32
    scf.if %2 {
      %c0_8 = arith.constant 0 : index
      %c0_9 = arith.constant 0 : index
      %10 = vector.load %arg2[%c0_8, %c0_9] : memref<16x128xf32, #tpu.memory_space<vmem>>, vector<16x128xf32>
      %cst_10 = arith.constant dense<0.000000e+00> : vector<16xf32>
      %11 = vector.multi_reduction <add>, %10, %cst_10 [1] : vector<16x128xf32> to vector<16xf32>
      %12 = vector.shape_cast %11 : vector<16xf32> to vector<16x1xf32>
      %13 = arith.mulf %10, %10 : vector<16x128xf32>
      %cst_11 = arith.constant dense<0.000000e+00> : vector<16xf32>
      %14 = vector.multi_reduction <add>, %13, %cst_11 [1] : vector<16x128xf32> to vector<16xf32>
      %15 = vector.shape_cast %14 : vector<16xf32> to vector<16x1xf32>
      %cst_12 = arith.constant 3.125000e-02 : f32
      %16 = vector.broadcast %cst_12 : f32 to vector<16x1xf32>
      %17 = arith.mulf %12, %16 : vector<16x1xf32>
      %cst_13 = arith.constant 3.125000e-02 : f32
      %18 = vector.broadcast %cst_13 : f32 to vector<16x1xf32>
      %19 = arith.mulf %15, %18 : vector<16x1xf32>
      %20 = arith.mulf %17, %17 : vector<16x1xf32>
      %21 = arith.subf %19, %20 : vector<16x1xf32>
      %cst_14 = arith.constant 0.000000e+00 : f32
      %22 = vector.broadcast %cst_14 : f32 to vector<16x1xf32>
      %23 = arith.maximumf %21, %22 : vector<16x1xf32>
      %cst_15 = arith.constant 9.99999974E-6 : f32
      %24 = vector.broadcast %cst_15 : f32 to vector<16x1xf32>
      %25 = arith.addf %23, %24 : vector<16x1xf32>
      %26 = math.rsqrt %25 : vector<16x1xf32>
      %27 = vector.broadcast %17 : vector<16x1xf32> to vector<16x128xf32>
      %28 = arith.subf %10, %27 : vector<16x128xf32>
      %29 = vector.broadcast %26 : vector<16x1xf32> to vector<16x128xf32>
      %30 = arith.mulf %28, %29 : vector<16x128xf32>
      %c0_16 = arith.constant 0 : index
      %c0_17 = arith.constant 0 : index
      %31 = vector.load %arg3[%c0_16, %c0_17] : memref<1x128xf32, #tpu.memory_space<vmem>>, vector<1x128xf32>
      %32 = vector.broadcast %31 : vector<1x128xf32> to vector<16x128xf32>
      %33 = arith.mulf %30, %32 : vector<16x128xf32>
      %c0_18 = arith.constant 0 : index
      %c0_19 = arith.constant 0 : index
      %34 = vector.load %arg4[%c0_18, %c0_19] : memref<1x128xf32, #tpu.memory_space<vmem>>, vector<1x128xf32>
      %35 = vector.broadcast %34 : vector<1x128xf32> to vector<16x128xf32>
      %36 = arith.addf %33, %35 : vector<16x128xf32>
      %37 = arith.truncf %36 : vector<16x128xf32> to vector<16x128xbf16>
      %c0_20 = arith.constant 0 : index
      %c0_21 = arith.constant 0 : index
      %38 = vector.load %arg8[%c0_20, %c0_21] : memref<16x128xbf16, #tpu.memory_space<vmem>>, vector<16x128xbf16>
      tpu.vector_store %arg8[%c0_20, %c0_21], %37 {strides = array<i32>} : memref<16x128xbf16, #tpu.memory_space<vmem>>, vector<16x128xbf16>,
    } else {
    }
    %c0 = arith.constant 0 : index
    %c0_1 = arith.constant 0 : index
    %3 = vector.load %arg8[%c0, %c0_1] : memref<16x128xbf16, #tpu.memory_space<vmem>>, vector<16x128xbf16>
    %c0_2 = arith.constant 0 : index
    %c0_3 = arith.constant 0 : index
    %4 = vector.load %arg5[%c0_2, %c0_3] : memref<128x128xbf16, #tpu.memory_space<vmem>>, vector<128x128xbf16>
    %cst = arith.constant dense<0.000000e+00> : vector<16x128xf32>
    %5 = tpu.matmul %3, %4, %cst {dimension_numbers = #tpu.dot_dimension_numbers<[1], [0], [0], [1], [0, 0, 1, 1], [], []>} : vector<16x128xbf16>, vector<128x128xbf16>, vector<16x128xf32> -> vector<16x128xf32>
    %c0_4 = arith.constant 0 : index
    %c0_5 = arith.constant 0 : index
    %6 = vector.load %arg6[%c0_4, %c0_5] : memref<1x128xf32, #tpu.memory_space<vmem>>, vector<1x128xf32>
    %7 = vector.broadcast %6 : vector<1x128xf32> to vector<16x128xf32>
    %8 = arith.addf %5, %7 : vector<16x128xf32>
    %c0_6 = arith.constant 0 : index
    %c0_7 = arith.constant 0 : index
    %9 = vector.load %arg7[%c0_6, %c0_7] : memref<16x128xf32, #tpu.memory_space<vmem>>, vector<16x128xf32>
    tpu.vector_store %arg7[%c0_6, %c0_7], %8 {strides = array<i32>} : memref<16x128xf32, #tpu.memory_space<vmem>>, vector<16x128xf32>,
    return
  }
  func.func @transform_0(%arg0: i32, %arg1: i32) -> (i32, i32) {
    %c0_i32 = arith.constant 0 : i32
    %c0_i32_0 = arith.constant 0 : i32
    return %arg0, %c0_i32 : i32, i32
  }
  func.func @transform_1(%arg0: i32, %arg1: i32) -> (i32, i32) {
    %c0_i32 = arith.constant 0 : i32
    %c0_i32_0 = arith.constant 0 : i32
    %c0_i32_1 = arith.constant 0 : i32
    return %c0_i32, %c0_i32_0 : i32, i32
  }
  func.func @transform_2(%arg0: i32, %arg1: i32) -> (i32, i32) {
    %c0_i32 = arith.constant 0 : i32
    %c0_i32_0 = arith.constant 0 : i32
    %c0_i32_1 = arith.constant 0 : i32
    return %c0_i32, %c0_i32_0 : i32, i32
  }
  func.func @transform_3(%arg0: i32, %arg1: i32) -> (i32, i32) {
    %c0_i32 = arith.constant 0 : i32
    %c0_i32_0 = arith.constant 0 : i32
    return %c0_i32, %arg1 : i32, i32
  }
  func.func @transform_4(%arg0: i32, %arg1: i32) -> (i32, i32) {
    %c0_i32 = arith.constant 0 : i32
    %c0_i32_0 = arith.constant 0 : i32
    return %c0_i32, %arg1 : i32, i32
  }
  func.func @transform_5(%arg0: i32, %arg1: i32) -> (i32, i32) {
    %c0_i32 = arith.constant 0 : i32
    return %arg0, %arg1 : i32, i32
  }
}

</mosaic_0001>

<bundles_post_ra>
// kernel: tpu_custom_call.1
= control target key start
LH: loop header
LB: loop body
LE: loop exit
PB: predicated region body
PF: predicated region fallthrough
CT: control target
= control target key end

     0   :  { %10 = vsyncpa [#allocation4], 0  ;;  %s460_s0 = inlined_call_operand.hbm [shape: f32[16,128], index: 0, kind: input, shape index: {}]   ;;  %s461_s1 = inlined_call_operand.vmem [shape: f32[1,128], index: 1, kind: input, shape index: {}]   ;;  %s462_s2 = inlined_call_operand.vmem [shape: f32[1,128], index: 2, kind: input, shape index: {}]   ;;  %s463_s3 = inlined_call_operand.hbm [shape: bf16[128,128], index: 3, kind: input, shape index: {}]   ;;  %s464_s4 = inlined_call_operand.vmem [shape: f32[1,128], index: 4, kind: input, shape index: {}]   ;;  %s465_s5 = inlined_call_operand.hbm [shape: f32[16,128], index: 5, kind: output, shape index: {}]  }
   0x1   :  { %11 = vsyncpa [#allocation7], 0 }
   0x2   :  { %12 = vsyncpa [#allocation5], 0  ;;  %s370_s18 = smov [#allocation3]   ;;  %s298_s22 = scalar_lea.hbm %s460_s0, 256 }
   0x3   :  { %s18_s19 = sshll.u32 %s370_s18, 4  ;;  %p299_p0 = scmp.ne.s32.totalorder %s460_s0, %s298_s22  ;;  %s19_s19 = int_to_ptr.vmem [resolvable:$true] %s18_s19 }
   0x4   :  { %p302_p1 = scmp.lt.u32.totalorder %s298_s22, %s460_s0 }
   0x6   :  { %p304_p2 = pnand %p302_p1, %p299_p0 }
   0x8   :  { %307 = shalt.err (!%p304_p2)
}
   0x9   :  { %s308_s27 = scalar_lea.vmem %s19_s19, 256  ;;  %p313_p4 = scmp.lt.s32.totalorder %s19_s19, %s19_s19 }
   0xa   :  { %p309_p3 = scmp.ne.s32.totalorder %s19_s19, %s308_s27  ;;  %p314_p5 = scmp.lt.s32.totalorder %s308_s27, %s308_s27 }
   0xc   :  { %p315_p6 = por %p314_p5, %p313_p4 }
   0xe   :  { %p316_p7 = pnand %p315_p6, %p309_p3 }
  0x10   :  { %319 = shalt.err (!%p316_p7)
}
  0x11   :  { %s371_s28 = smov 128   ;;  %s372_s29 = smov 8  }
  0x12   :  { %24 = dma.hbm_to_vmem [thread:$0]  %s460_s0, 256, %s19_s19, [#allocation4], %s371_s28, %s371_s28, %s372_s29  }
  0x13   :  { %s373_s7 = smov [#allocation6]   ;;  %s320_s11 = scalar_lea.hbm %s463_s3, 1024 }
  0x14   :  { %s34_s8 = sshll.u32 %s373_s7, 4  ;;  %p321_p8 = scmp.ne.s32.totalorder %s463_s3, %s320_s11  ;;  %s35_s8 = int_to_ptr.vmem [resolvable:$true] %s34_s8 }
  0x15   :  { %p324_p9 = scmp.lt.u32.totalorder %s320_s11, %s463_s3 }
  0x17   :  { %p326_p10 = pnand %p324_p9, %p321_p8 }
  0x19   :  { %329 = shalt.err (!%p326_p10)
}
  0x1a   :  { %s330_s16 = scalar_lea.vmem %s35_s8, 1024  ;;  %p335_p12 = scmp.lt.s32.totalorder %s35_s8, %s35_s8 }
  0x1b   :  { %p331_p11 = scmp.ne.s32.totalorder %s35_s8, %s330_s16  ;;  %p336_p13 = scmp.lt.s32.totalorder %s330_s16, %s330_s16 }
  0x1d   :  { %p337_p0 = por %p336_p13, %p335_p12 }
  0x1f   :  { %p338_p1 = pnand %p337_p0, %p331_p11 }
  0x21   :  { %341 = shalt.err (!%p338_p1)
}
  0x22   :  { %s374_s0 = smov 64   ;;  %s375_s17 = smov 4  }
  0x23   :  { %40 = dma.hbm_to_vmem [thread:$0]  %s463_s3, 1024, %s35_s8, [#allocation7], %s374_s0, %s374_s0, %s375_s17  }
  0x24   :  { %364 = dma.done.wait [#allocation4], 256  }
  0x25   :  { %365 = vsyncadd [#allocation4], 4294967040 }
  0x26   :  { %366 = dma.done.wait [#allocation7], 1024  }
  0x27   :  { %367 = vsyncadd [#allocation7], 4294966272  ;;  %v54_v0 = vld [vmem:[#allocation3] sm:$0xff]  ;;  %v55_v1 = vld [vmem:[#allocation3 + $0x8] sm:$0xff]  ;;  %v376_v5 = vmov 0.0   ;;  %vm377_vm0 = vmmov 0  }
  0x28   :  { %56 = vadd.xlane.f32.xlu0 %v54_v0  ;;  %v60_v2 = vmul.f32 %v54_v0, %v54_v0  ;;  %v61_v3 = vmul.f32 %v55_v1, %v55_v1  ;;  %v286_v4 = vld [vmem:[#allocation6] sm:$0xff]   ;;  %257 = vmatprep.subr.bf16.mxu0 %v376_v5  ;;  %v287_v6 = vld [vmem:[#allocation6 + $0x8] sm:$0xff]   ;;  %v288_v7 = vld [vmem:[#allocation6 + $0x10] sm:$0xff]   ;;  %s378_s25 = smov [#allocation8]  }
  0x29   :  { %258 = vmatpush3.bf16.msra.mxu0 %v286_v4  ;;  %v289_v8 = vld [vmem:[#allocation6 + $0x18] sm:$0xff]   ;;  %v290_v9 = vld [vmem:[#allocation6 + $0x20] sm:$0xff]   ;;  %273 = vmatprep.mubr.msk.bf16.mxu0 %vm377_vm0, %v376_v5  ;;  %v291_v10 = vld [vmem:[#allocation6 + $0x28] sm:$0xff]  }
  0x2a   :  { %62 = vadd.xlane.f32.xlu1 %v60_v2  ;;  %259 = vmatprep.subr.bf16.mxu0 %v376_v5  ;;  %v292_v11 = vld [vmem:[#allocation6 + $0x30] sm:$0xff]   ;;  %v293_v12 = vld [vmem:[#allocation6 + $0x38] sm:$0xff]  }
  0x2b   :  { %v237_v32 = vld [vmem:[%s461_s1] ss:$0 sm:$0xff]  ;;  %s224_s1 = sshll.u32 %s378_s25, 4  ;;  %s225_s1 = int_to_ptr.vmem [resolvable:$true] %s224_s1 }
  0x2c   :  { %58 = vadd.xlane.f32.xlu0 %v55_v1  ;;  %v238_v37 = vld [vmem:[%s462_s2] ss:$0 sm:$0xff]  ;;  %s342_s2 = scalar_lea.vmem %s225_s1, 256  ;;  %p347_p3 = scmp.lt.s32.totalorder %s225_s1, %s225_s1 }
  0x2d   :  { %260 = vmatpush3.bf16.msra.mxu0 %v287_v6  ;;  %v239_v42 = vld [vmem:[%s464_s4] ss:$0 sm:$0xff]  ;;  %p343_p2 = scmp.ne.s32.totalorder %s225_s1, %s342_s2  ;;  %p348_p4 = scmp.lt.s32.totalorder %s342_s2, %s342_s2 }
  0x2e   :  { %64 = vadd.xlane.f32.xlu1 %v61_v3  ;;  %261 = vmatprep.subr.bf16.mxu0 %v376_v5 }
  0x2f   :  { %p349_p5 = por %p348_p4, %p347_p3 }
  0x31   :  { %262 = vmatpush3.bf16.msra.mxu0 %v288_v7  ;;  %p350_p6 = pnand %p349_p5, %p343_p2 }
  0x32   :  { %263 = vmatprep.subr.bf16.mxu0 %v376_v5 }
  0x35   :  { %264 = vmatpush3.bf16.msra.mxu0 %v289_v8 }
  0x36   :  { %265 = vmatprep.subr.bf16.mxu0 %v376_v5 }
  0x39   :  { %266 = vmatpush3.bf16.msra.mxu0 %v290_v9 }
  0x3a   :  { %267 = vmatprep.subr.bf16.mxu0 %v376_v5 }
  0x3d   :  { %268 = vmatpush3.bf16.msra.mxu0 %v291_v10 }
  0x3e   :  { %269 = vmatprep.subr.bf16.mxu0 %v376_v5 }
  0x41   :  { %270 = vmatpush3.bf16.msra.mxu0 %v292_v11 }
  0x42   :  { %271 = vmatprep.subr.bf16.mxu0 %v376_v5 }
  0x45   :  { %272 = vmatpush3.bf16.msra.mxu0 %v293_v12 }
  0xb5   :  { %v57_v13 = vpop.xlane.xlu0 %56 }
  0xb6   :  { %v66_v14 = vmul.f32 0.03125, %v57_v13 }
  0xb7   :  { %v63_v15 = vpop.xlane.xlu1 %62 }
  0xb8   :  { %v70_v16 = vmul.f32 %v66_v14, %v66_v14  ;;  %v68_v17 = vmul.f32 0.03125, %v63_v15  ;;  %v80_v29 = vsub.f32 %v54_v0, %v66_v14 }
  0xb9   :  { %v59_v18 = vpop.xlane.xlu0 %58 }
  0xba   :  { %v72_v19 = vsub.f32 %v68_v17, %v70_v16  ;;  %v67_v20 = vmul.f32 0.03125, %v59_v18 }
  0xbb   :  { %v65_v21 = vpop.xlane.xlu1 %64 }
  0xbc   :  { %v74_v22 = vmax.f32 %v72_v19, 0.0  ;;  %v71_v23 = vmul.f32 %v67_v20, %v67_v20  ;;  %v69_v24 = vmul.f32 0.03125, %v65_v21  ;;  %v81_v33 = vsub.f32 %v55_v1, %v67_v20 }
  0xbe   :  { %v76_v25 = vadd.f32 1e-05, %v74_v22  ;;  %v73_v26 = vsub.f32 %v69_v24, %v71_v23 }
  0xc0   :  { %294 = vrsqrt.f32 %v76_v25  ;;  %v75_v27 = vmax.f32 %v73_v26, 0.0 }
  0xc2   :  { %v77_v28 = vadd.f32 1e-05, %v75_v27 }
  0xc4   :  { %296 = vrsqrt.f32 %v77_v28 }
  0xca   :  { %v295_v30 = vpop.eup %294 }
  0xcb   :  { %v82_v31 = vmul.f32 %v295_v30, %v80_v29 }
  0xcd   :  { %v91_v36 = vmul.f32 %v237_v32, %v82_v31 }
  0xce   :  { %v297_v34 = vpop.eup %296 }
  0xcf   :  { %v83_v35 = vmul.f32 %v297_v34, %v81_v33  ;;  %v100_v39 = vadd.f32 %v238_v37, %v91_v36 }
  0xd1   :  { %v92_v38 = vmul.f32 %v237_v32, %v83_v35 }
  0xd3   :  { %v101_v40 = vadd.f32 %v238_v37, %v92_v38 }
  0xd5   :  { %v102_v41 = vpack.c.bf16 %v101_v40, %v100_v39 }
  0xd7   :  { %274 = vmatmul.mubr.bf16.vlgmr.msra.gmra.mrb[0].mxu0 %v102_v41 }
 0x1aa   :  { %v210_v43 = vpop.f32.mrb[0].mxu0 }
 0x1ab   :  { %v211_v44 = vadd.f32 %v239_v42, %v210_v43  ;;  %v275_v45 = vpop.f32.mrb[1].mxu0 }
 0x1ac   :  { %v213_v46 = vpop.f32.mrb[2].mxu0 }
 0x1ad   :  { %217 = vst [vmem:[#allocation8] sm:$0xff] %v211_v44  ;;  %v214_v47 = vadd.f32 %v239_v42, %v213_v46  ;;  %v276_v48 = vpop.f32.mrb[3].mxu0 }
 0x1af   :  { %218 = vst [vmem:[#allocation8 + $0x8] sm:$0xff] %v214_v47 }
 0x1b0   :  { %353 = shalt.err (!%p350_p6)
}
 0x1b1   :  { %s354_s27 = scalar_lea.hbm %s465_s5, 256 }
 0x1b2   :  { %p355_p7 = scmp.ne.s32.totalorder %s465_s5, %s354_s27  ;;  %p358_p8 = scmp.lt.u32.totalorder %s354_s27, %s465_s5 }
 0x1b4   :  { %p360_p9 = pnand %p358_p8, %p355_p7 }
 0x1b6   :  { %363 = shalt.err (!%p360_p9)
}
 0x1b7   :  { %230 = dma.vmem_to_hbm [thread:$0]  %s225_s1, 256, %s465_s5, [#allocation5], %s371_s28, %s371_s28, %s372_s29  }
 0x1b8   :  { %368 = dma.done.wait [#allocation5], 256  }
 0x1b9   :  { %369 = vsyncadd [#allocation5], 4294967040 }
 0x1ba   :  { %234 = vsyncpa [#allocation4], 1 }
 0x1bb   :  { %235 = vsyncpa [#allocation7], 1 }
 0x1bc   :  { %236 = vsyncpa [#allocation5], 1 }

</bundles_post_ra>
